<compile_context>
chip_gen: v7x
topology: tpu7x:2x2x1
jax: 0.10.0
libtpu: 0.0.40
codegen_flags: <defaults>
</compile_context>

<pallas_src>
import jax
import jax.numpy as jnp
from jax.experimental import pallas as pl
from jax.experimental.pallas import tpu as pltpu

_LANES = 128                   # vreg lane width: slab last dim is always 128
_MAX_BLOCK_ROWS = 8192         # 8192*128*4B = 4 MiB f32 tile
_SINGLE_BLOCK_ROWS = 512       # below this a multi-step grid is pure overhead
_VMEM_LIMIT_BYTES = 32 << 20   # 16 MiB dbuf tiles fit; safe on v5e/v6e/v7x


def _round_up(x: int, m: int) -> int:
    return ((x + m - 1) // m) * m


def _probmask_kernel(slope_ref, logits_ref, out_ref):
    # Elementwise sigmoid(slope * x) on a lane-dense (block_rows, 128) tile.
    # sigmoid(s*x) == 0.5 * (tanh(0.5*s*x) + 1): one EUP transcendental plus
    # two VPU ops; the DMA / store path is the only binder.
    slope = slope_ref[0]
    z = (0.5 * slope) * logits_ref[...]
    out_ref[...] = (0.5 * (jnp.tanh(z) + 1.0)).astype(out_ref.dtype)


def probmask_apply_slab(logits_slab: jax.Array, slope,
                        out_dtype=jnp.float32) -> jax.Array:
    """sigmoid(slope * logits) on a pre-padded lane-dense (rows, 128) slab.

    `slope` may be a Python float or a traced scalar; it is passed to the
    kernel as a runtime SMEM scalar so changing it never retraces the kernel.
    `out_dtype=jnp.bfloat16` halves store traffic if the consumer allows it.
    """
    rows, lanes = logits_slab.shape
    assert lanes == _LANES, lanes
    slope_arr = jnp.asarray(slope, dtype=jnp.float32).reshape(1)

    if rows <= _SINGLE_BLOCK_ROWS:
        # Single full-extent block (legal even when rows % 8 != 0).
        block_rows = rows
    else:
        # At least 2 grid steps (so v7x's two TensorCores split the slab),
        # capped at 4 MiB tiles so in+out double-buffering fits scoped VMEM.
        block_rows = min(_MAX_BLOCK_ROWS, _round_up(pl.cdiv(rows, 2), 8))
    grid = (pl.cdiv(rows, block_rows),)   # ragged last block handled by Pallas

    return pl.pallas_call(
        _probmask_kernel,
        out_shape=jax.ShapeDtypeStruct((rows, _LANES), out_dtype),
        grid=grid,
        in_specs=[
            pl.BlockSpec(memory_space=pltpu.MemorySpace.SMEM),   # slope scalar
            pl.BlockSpec((block_rows, _LANES), lambda i: (i, 0),
                         memory_space=pltpu.MemorySpace.VMEM),
        ],
        out_specs=pl.BlockSpec((block_rows, _LANES), lambda i: (i, 0),
                               memory_space=pltpu.MemorySpace.VMEM),
        compiler_params=pltpu.CompilerParams(
            dimension_semantics=("parallel",),
            vmem_limit_bytes=_VMEM_LIMIT_BYTES),
    )(slope_arr, logits_slab)


def logits_to_slab(logits: jax.Array) -> jax.Array:
    """One-time layout change at init: flatten + zero-pad to (rows, 128)."""
    flat = logits.reshape(-1)
    total = flat.shape[0]
    rows = pl.cdiv(total, _LANES)
    pad = rows * _LANES - total
    if pad:
        flat = jnp.pad(flat, (0, pad))
    return flat.reshape(rows, _LANES)


def init_probmask_logits(key, shape, slope=5.0, eps=0.01,
                         preselect=False, preselect_num=0):
    """Re-implementation of ProbMask._slope_random_uniform.
    Returns logits of shape (1, H, W, 1)."""
    H, W = shape
    temp = jax.random.uniform(key, (H, W), dtype=jnp.float32,
                              minval=eps, maxval=1.0 - eps)
    logits = -jnp.log(1.0 / temp - 1.0) / slope
    logits = logits.reshape(1, H, W, 1)
    k = preselect_num // 2
    if preselect and k > 0:
        logits = logits.at[:, :k, :k].set(-100.0)
        logits = logits.at[:, :k, W - k:].set(-100.0)
        logits = logits.at[:, H - k:, :k].set(-100.0)
        logits = logits.at[:, H - k:, W - k:].set(-100.0)
    return logits


class ProbMaskPallas:
    """Mirror of the PyTorch ProbMask module (forward only)."""

    def __init__(self, shape=(320, 320), slope=5.0, preselect=False,
                 preselect_num=0, key=None, out_dtype=jnp.float32):
        self.slope = jnp.float32(slope)   # runtime scalar; annealing-friendly
        self.out_dtype = out_dtype
        if key is None:
            key = jax.random.PRNGKey(0)
        # (1, H, W, 1) logits, identical to the PyTorch parameter.
        self.mask = init_probmask_logits(
            key, shape, slope=float(slope), preselect=preselect,
            preselect_num=preselect_num)
        # The "real" kernel parameter: lane-dense (rows, 128) slab, padded
        # once here so the forward path has no pad/copy glue.
        self.mask_slab = logits_to_slab(self.mask)
        self.total = int(shape[0]) * int(shape[1])

    def __call__(self, x_nhwc: jax.Array) -> jax.Array:
        # `x` only supplies the (H, W) shape, exactly like the PyTorch forward.
        _, H, W, _ = x_nhwc.shape
        assert H * W == self.total, (H, W, self.total)
        out_slab = probmask_apply_slab(self.mask_slab, self.slope,
                                       out_dtype=self.out_dtype)
        out_flat = out_slab.reshape(-1)
        if out_flat.shape[0] != H * W:        # only when H*W % 128 != 0
            out_flat = out_flat[:H * W]
        return out_flat.reshape(1, H, W, 1)


if __name__ == "__main__":
    key = jax.random.PRNGKey(0)
    k_mask, k_mask2, k_mask3, k_x = jax.random.split(key, 4)

    # --- small 16x16 case (H*W = 256 -> lane-dense (2, 128) slab, 1 block) ---
    H, W = 16, 16
    module = ProbMaskPallas(shape=(H, W), slope=5.0, key=k_mask)
    x = jax.random.normal(k_x, (2, H, W, 2), dtype=jnp.float32)  # values unused
    out = jax.block_until_ready(module(x))
    ref = jax.nn.sigmoid(5.0 * module.mask.reshape(1, H, W, 1))
    assert out.shape == (1, H, W, 1), out.shape
    assert jnp.allclose(out, ref, atol=1e-5), "mismatch vs reference (16x16)"

    # --- non-128-divisible case (18*18 = 324 -> padded (3, 128) slab) ---
    H2, W2 = 18, 18
    module2 = ProbMaskPallas(shape=(H2, W2), slope=5.0,
                             preselect=True, preselect_num=4, key=k_mask2)
    x2 = jnp.zeros((1, H2, W2, 1), dtype=jnp.float32)
    out2 = jax.block_until_ready(module2(x2))
    ref2 = jax.nn.sigmoid(5.0 * module2.mask.reshape(1, H2, W2, 1))
    assert out2.shape == (1, H2, W2, 1), out2.shape
    assert jnp.allclose(out2, ref2, atol=1e-5), "mismatch vs reference (18x18)"

    # --- module-default 320x320 (rows=800 -> 2-step "parallel" grid) ---
    H3, W3 = 320, 320
    module3 = ProbMaskPallas(shape=(H3, W3), slope=5.0, key=k_mask3)
    x3 = jnp.zeros((1, H3, W3, 2), dtype=jnp.float32)
    out3 = jax.block_until_ready(module3(x3))
    ref3 = jax.nn.sigmoid(5.0 * module3.mask.reshape(1, H3, W3, 1))
    assert out3.shape == (1, H3, W3, 1), out3.shape
    assert jnp.allclose(out3, ref3, atol=1e-5), "mismatch vs reference (320x320)"

    print("KERNEL_OK")
</pallas_src>

<mosaic_0001>
module attributes {stable_mosaic.version = 11 : i64} {
  func.func @_probmask_kernel(%arg0: i32, %arg1: memref<1xf32, #tpu.memory_space<smem>>, %arg2: memref<2x128xf32, #tpu.memory_space<vmem>>, %arg3: memref<2x128xf32, #tpu.memory_space<vmem>>) attributes {dimension_semantics = [#tpu.dimension_semantics<parallel>], iteration_bounds = array<i64: 1>, scalar_prefetch = 0 : i64, scratch_operands = 0 : i64, tpu.core_type = #tpu.core_type<tc>, window_params = [{transform_indices = @transform_0, window_bounds = array<i64: 1>}, {transform_indices = @transform_1, window_bounds = array<i64: 2, 128>}, {transform_indices = @transform_2, window_bounds = array<i64: 2, 128>}]} {
    %c0 = arith.constant 0 : index
    %0 = memref.load %arg1[%c0] : memref<1xf32, #tpu.memory_space<smem>>
    %cst = arith.constant 5.000000e-01 : f32
    %1 = arith.mulf %cst, %0 : f32
    %c0_0 = arith.constant 0 : index
    %c0_1 = arith.constant 0 : index
    %2 = vector.load %arg2[%c0_0, %c0_1] : memref<2x128xf32, #tpu.memory_space<vmem>>, vector<2x128xf32>
    %3 = vector.broadcast %1 : f32 to vector<2x128xf32>
    %4 = arith.mulf %3, %2 : vector<2x128xf32>
    %5 = math.tanh %4 : vector<2x128xf32>
    %cst_2 = arith.constant 1.000000e+00 : f32
    %6 = vector.broadcast %cst_2 : f32 to vector<2x128xf32>
    %7 = arith.addf %5, %6 : vector<2x128xf32>
    %cst_3 = arith.constant 5.000000e-01 : f32
    %8 = vector.broadcast %cst_3 : f32 to vector<2x128xf32>
    %9 = arith.mulf %8, %7 : vector<2x128xf32>
    %c0_4 = arith.constant 0 : index
    %c0_5 = arith.constant 0 : index
    %10 = vector.load %arg3[%c0_4, %c0_5] : memref<2x128xf32, #tpu.memory_space<vmem>>, vector<2x128xf32>
    tpu.vector_store %arg3[%c0_4, %c0_5], %9 {strides = array<i32>} : memref<2x128xf32, #tpu.memory_space<vmem>>, vector<2x128xf32>,
    return
  }
  func.func @transform_0(%arg0: i32) -> i32 {
    %c0_i32 = arith.constant 0 : i32
    %c0_i32_0 = arith.constant 0 : i32
    return %c0_i32 : i32
  }
  func.func @transform_1(%arg0: i32) -> (i32, i32) {
    %c0_i32 = arith.constant 0 : i32
    %c0_i32_0 = arith.constant 0 : i32
    return %arg0, %c0_i32 : i32, i32
  }
  func.func @transform_2(%arg0: i32) -> (i32, i32) {
    %c0_i32 = arith.constant 0 : i32
    %c0_i32_0 = arith.constant 0 : i32
    return %arg0, %c0_i32 : i32, i32
  }
}

</mosaic_0001>

<bundles_post_ra>
// kernel: tpu_custom_call.1
= control target key start
LH: loop header
LB: loop body
LE: loop exit
PB: predicated region body
PF: predicated region fallthrough
CT: control target
= control target key end

     0   :  { %s97_s0 = inlined_call_operand.<no memory space> [shape: f32[1], index: 0, kind: input, shape index: {}]   ;;  %s98_s1 = inlined_call_operand.vmem [shape: f32[2,128], index: 1, kind: input, shape index: {}]   ;;  %s99_s2 = inlined_call_operand.hbm [shape: f32[2,128], index: 2, kind: output, shape index: {}]  }
   0x1   :  { %s14_s11 = smul.f32 0.5, %s97_s0  ;;  %v15_v0 = vld [vmem:[%s98_s1] sm:$0x3] }
   0x2   :  { %8 = vsyncpa [#allocation4], 0  ;;  %s63_s14 = smov [#allocation3]  }
   0x3   :  { %v16_v1 = vstv %s14_s11  ;;  %s28_s15 = sshll.u32 %s63_s14, 4  ;;  %s29_s15 = int_to_ptr.vmem [resolvable:$true] %s28_s15 }
   0x4   :  { %v17_v2 = vmul.f32 %v16_v1, %v15_v0  ;;  %s39_s16 = scalar_lea.vmem %s29_s15, 32  ;;  %p44_p1 = scmp.lt.s32.totalorder %s29_s15, %s29_s15 }
   0x5   :  { %p40_p0 = scmp.ne.s32.totalorder %s29_s15, %s39_s16  ;;  %p45_p2 = scmp.lt.s32.totalorder %s39_s16, %s39_s16 }
   0x6   :  { %37 = vtanh.f32 %v17_v2 }
   0x7   :  { %p46_p3 = por %p45_p2, %p44_p1 }
   0x9   :  { %p47_p4 = pnand %p46_p3, %p40_p0 }
  0x10   :  { %v38_v3 = vpop.eup %37 }
  0x11   :  { %v19_v4 = vadd.f32 1.0, %v38_v3 }
  0x13   :  { %v20_v5 = vmul.f32 0.5, %v19_v4 }
  0x15   :  { %21 = vst [vmem:[#allocation3] sm:$0x3] %v20_v5 }
  0x16   :  { %50 = shalt.err (!%p47_p4)
}
  0x17   :  { %s51_s17 = scalar_lea.hbm %s99_s2, 32 }
  0x18   :  { %p52_p5 = scmp.ne.s32.totalorder %s99_s2, %s51_s17  ;;  %p55_p6 = scmp.lt.u32.totalorder %s51_s17, %s99_s2 }
  0x1a   :  { %p57_p7 = pnand %p55_p6, %p52_p5 }
  0x1c   :  { %60 = shalt.err (!%p57_p7)
}
  0x1d   :  { %31 = dma.vmem_to_hbm [thread:$0]  %s29_s15, 32, %s99_s2, [#allocation4]  }
  0x1e   :  { %61 = dma.done.wait [#allocation4], 32  }
  0x1f   :  { %62 = vsyncadd [#allocation4], 4294967264 }
  0x20   :  { %35 = vsyncpa [#allocation4], 1 }

</bundles_post_ra>
